<compile_context>
chip_gen: v7x
topology: tpu7x:2x2x1
jax: 0.10.0
libtpu: 0.0.40
codegen_flags: <defaults>
</compile_context>

<pallas_src>
import numpy as np
import jax
import jax.numpy as jnp
from jax import lax
from jax.experimental import pallas as pl
from jax.experimental.pallas import tpu as pltpu


N_FEATURES = 128
LANE = 128          # TPU lane width: pad output features to this (dense vst)
MAX_TILE_B = 256    # batch tile; sized for v6e/v7x MXU (>=256 rows) & VMEM


def _round_up(x, m):
    return (x + m - 1) // m * m


# --------------------------------------------------------------------------
# Kernels
# --------------------------------------------------------------------------
def _mlp_body(x_ref, w1_ref, b1_ref, w2_ref, b2_ref, w3_ref, b3_ref):
    """Shared 3-layer MLP: bf16 MXU matmuls, f32 accumulate / bias / ReLU."""
    x = x_ref[...].astype(jnp.bfloat16)          # in-kernel cast (free on VPU)
    h1 = jnp.dot(x, w1_ref[...], preferred_element_type=jnp.float32) + b1_ref[...]
    h1 = jnp.maximum(h1, 0.0).astype(jnp.bfloat16)
    h2 = jnp.dot(h1, w2_ref[...], preferred_element_type=jnp.float32) + b2_ref[...]
    h2 = jnp.maximum(h2, 0.0).astype(jnp.bfloat16)
    q = jnp.dot(h2, w3_ref[...], preferred_element_type=jnp.float32) + b3_ref[...]
    return q                                     # (TILE_B, O_PAD) f32


def _mlp_kernel(x_ref, w1_ref, b1_ref, w2_ref, b2_ref, w3_ref, b3_ref, o_ref):
    q = _mlp_body(x_ref, w1_ref, b1_ref, w2_ref, b2_ref, w3_ref, b3_ref)
    o_ref[...] = q.astype(o_ref.dtype)


def _mlp_gather_kernel(x_ref, a_ref, w1_ref, b1_ref, w2_ref, b2_ref, w3_ref,
                       b3_ref, o_ref):
    q = _mlp_body(x_ref, w1_ref, b1_ref, w2_ref, b2_ref, w3_ref, b3_ref)
    act = a_ref[...]                                        # (TILE_B, 1) int32
    col = lax.broadcasted_iota(jnp.int32, q.shape, 1)       # (TILE_B, O_PAD)
    q_sel = jnp.sum(jnp.where(col == act, q, 0.0), axis=1, keepdims=True)
    # lane-dense store: broadcast the gathered value across all 128 lanes
    o_ref[...] = jnp.broadcast_to(q_sel, o_ref.shape).astype(o_ref.dtype)


# --------------------------------------------------------------------------
# Parameters
# --------------------------------------------------------------------------
def init_params(key, input_shape, n_output):
    """Torch-Linear-like uniform init; weights stored bf16, w3/b3 lane-padded."""
    d_in = int(np.prod(input_shape))
    o_pad = _round_up(n_output, LANE)
    dims = [(d_in, N_FEATURES), (N_FEATURES, N_FEATURES), (N_FEATURES, n_output)]
    params = {"n_output": n_output}
    for i, (fan_in, fan_out) in enumerate(dims, start=1):
        key, kw, kb = jax.random.split(key, 3)
        bound = 1.0 / np.sqrt(fan_in)
        w = jax.random.uniform(kw, (fan_in, fan_out), jnp.float32, -bound, bound)
        bias = jax.random.uniform(kb, (1, fan_out), jnp.float32, -bound, bound)
        if i == 3 and fan_out != o_pad:          # zero-pad to lane-dense width
            w = jnp.pad(w, ((0, 0), (0, o_pad - fan_out)))
            bias = jnp.pad(bias, ((0, 0), (0, o_pad - fan_out)))
        params[f"w{i}"] = w.astype(jnp.bfloat16)  # MXU inputs in bf16
        params[f"b{i}"] = bias                    # biases stay f32 (f32 acc path)
    return params


# --------------------------------------------------------------------------
# Forward
# --------------------------------------------------------------------------
def _const_spec(arr):
    # weight / bias stays resident across the batch grid
    return pl.BlockSpec(arr.shape, lambda i: (0, 0))


def simple_resource_network_forward(params, state, action=None):
    """Equivalent of SimpleResourceNetwork.forward."""
    b = state.shape[0]
    x = state.reshape(b, -1)                    # native dtype; cast in-kernel
    d = x.shape[1]
    n_output = params["n_output"]
    o_pad = params["w3"].shape[1]

    tile_b = b if b < MAX_TILE_B else MAX_TILE_B
    grid = (pl.cdiv(b, tile_b),)

    weights = (params["w1"], params["b1"], params["w2"], params["b2"],
               params["w3"], params["b3"])
    weight_specs = [_const_spec(w) for w in weights]
    x_spec = pl.BlockSpec((tile_b, d), lambda i: (i, 0))
    compiler_params = pltpu.CompilerParams(
        dimension_semantics=("parallel",),       # shard batch tiles over TCs (v7x)
        vmem_limit_bytes=32 * 1024 * 1024,       # well under v7x's 64 MiB VMEM
    )

    if action is None:
        q_pad = pl.pallas_call(
            _mlp_kernel,
            grid=grid,
            out_shape=jax.ShapeDtypeStruct((b, o_pad), jnp.float32),
            in_specs=[x_spec] + weight_specs,
            out_specs=pl.BlockSpec((tile_b, o_pad), lambda i: (i, 0)),
            compiler_params=compiler_params,
        )(x, *weights)
        return q_pad[:, :n_output]

    # fused in-kernel gather (q.gather(1, action)) — no separate q round trip
    act = action.reshape(b, 1).astype(jnp.int32)
    q_sel = pl.pallas_call(
        _mlp_gather_kernel,
        grid=grid,
        out_shape=jax.ShapeDtypeStruct((b, LANE), jnp.float32),
        in_specs=[x_spec, pl.BlockSpec((tile_b, 1), lambda i: (i, 0))]
                 + weight_specs,
        out_specs=pl.BlockSpec((tile_b, LANE), lambda i: (i, 0)),
        compiler_params=compiler_params,
    )(x, act, *weights)
    # matches torch.squeeze(q.gather(1, action)): (B,) for B>1, scalar for B==1
    return jnp.squeeze(q_sel[:, :1])


# --------------------------------------------------------------------------
# Pure-JAX reference (mimics the kernel's bf16-in / f32-acc numerics)
# --------------------------------------------------------------------------
def _reference(params, state, action=None):
    b = state.shape[0]
    n_output = params["n_output"]
    x = state.reshape(b, -1).astype(jnp.bfloat16).astype(jnp.float32)
    w1 = params["w1"].astype(jnp.float32)
    w2 = params["w2"].astype(jnp.float32)
    w3 = params["w3"].astype(jnp.float32)
    h1 = jnp.maximum(x @ w1 + params["b1"], 0.0)
    h1 = h1.astype(jnp.bfloat16).astype(jnp.float32)
    h2 = jnp.maximum(h1 @ w2 + params["b2"], 0.0)
    h2 = h2.astype(jnp.bfloat16).astype(jnp.float32)
    q = (h2 @ w3 + params["b3"])[:, :n_output]
    if action is None:
        return q
    return jnp.squeeze(jnp.take_along_axis(q, action.astype(jnp.int32), axis=1))


if __name__ == "__main__":
    # Small synthetic problem: input_shape=(4, 4) -> D=16, n_output=8
    input_shape = (4, 4)
    output_shape = (8,)
    edges = list(range(5))       # only used for len() in the torch module
    resources = list(range(3))

    key = jax.random.PRNGKey(0)
    key, kp, ks, ka = jax.random.split(key, 4)

    params = init_params(kp, input_shape, output_shape[-1])

    batch = 2
    state = jax.random.normal(ks, (batch,) + input_shape, jnp.float32)
    action = jax.random.randint(ka, (batch, 1), 0, output_shape[-1])

    q = simple_resource_network_forward(params, state)                 # (B, n_output)
    q_acted = simple_resource_network_forward(params, state, action)   # (B,)

    jax.block_until_ready(q)
    jax.block_until_ready(q_acted)

    assert q.shape == (batch, output_shape[-1])
    assert q_acted.shape == (batch,)

    q_ref = _reference(params, state)
    q_acted_ref = _reference(params, state, action)
    np.testing.assert_allclose(np.asarray(q), np.asarray(q_ref),
                               rtol=1e-2, atol=1e-2)
    np.testing.assert_allclose(np.asarray(q_acted), np.asarray(q_acted_ref),
                               rtol=1e-2, atol=1e-2)

    print("KERNEL_OK")
</pallas_src>

<mosaic_0001>
module attributes {stable_mosaic.version = 11 : i64} {
  func.func @_mlp_kernel(%arg0: i32, %arg1: memref<2x16xf32, #tpu.memory_space<vmem>>, %arg2: memref<16x128xbf16, #tpu.memory_space<vmem>>, %arg3: memref<1x128xf32, #tpu.memory_space<vmem>>, %arg4: memref<128x128xbf16, #tpu.memory_space<vmem>>, %arg5: memref<1x128xf32, #tpu.memory_space<vmem>>, %arg6: memref<128x128xbf16, #tpu.memory_space<vmem>>, %arg7: memref<1x128xf32, #tpu.memory_space<vmem>>, %arg8: memref<2x128xf32, #tpu.memory_space<vmem>>) attributes {dimension_semantics = [#tpu.dimension_semantics<parallel>], iteration_bounds = array<i64: 1>, scalar_prefetch = 0 : i64, scratch_operands = 0 : i64, tpu.core_type = #tpu.core_type<tc>, window_params = [{transform_indices = @transform_0, window_bounds = array<i64: 2, 16>}, {pipeline_mode = #tpu.pipeline_mode<synchronous>, transform_indices = @transform_1, window_bounds = array<i64: 16, 128>}, {pipeline_mode = #tpu.pipeline_mode<synchronous>, transform_indices = @transform_2, window_bounds = array<i64: 1, 128>}, {pipeline_mode = #tpu.pipeline_mode<synchronous>, transform_indices = @transform_3, window_bounds = array<i64: 128, 128>}, {pipeline_mode = #tpu.pipeline_mode<synchronous>, transform_indices = @transform_4, window_bounds = array<i64: 1, 128>}, {pipeline_mode = #tpu.pipeline_mode<synchronous>, transform_indices = @transform_5, window_bounds = array<i64: 128, 128>}, {pipeline_mode = #tpu.pipeline_mode<synchronous>, transform_indices = @transform_6, window_bounds = array<i64: 1, 128>}, {transform_indices = @transform_7, window_bounds = array<i64: 2, 128>}]} {
    %c0 = arith.constant 0 : index
    %c0_0 = arith.constant 0 : index
    %0 = vector.load %arg1[%c0, %c0_0] : memref<2x16xf32, #tpu.memory_space<vmem>>, vector<2x16xf32>
    %1 = arith.truncf %0 : vector<2x16xf32> to vector<2x16xbf16>
    %c0_1 = arith.constant 0 : index
    %c0_2 = arith.constant 0 : index
    %2 = vector.load %arg2[%c0_1, %c0_2] : memref<16x128xbf16, #tpu.memory_space<vmem>>, vector<16x128xbf16>
    %cst = arith.constant dense<0.000000e+00> : vector<2x128xf32>
    %3 = tpu.matmul %1, %2, %cst {dimension_numbers = #tpu.dot_dimension_numbers<[1], [0], [0], [1], [0, 0, 1, 1], [], []>} : vector<2x16xbf16>, vector<16x128xbf16>, vector<2x128xf32> -> vector<2x128xf32>
    %c0_3 = arith.constant 0 : index
    %c0_4 = arith.constant 0 : index
    %4 = vector.load %arg3[%c0_3, %c0_4] : memref<1x128xf32, #tpu.memory_space<vmem>>, vector<1x128xf32>
    %5 = vector.broadcast %4 : vector<1x128xf32> to vector<2x128xf32>
    %6 = arith.addf %3, %5 : vector<2x128xf32>
    %cst_5 = arith.constant 0.000000e+00 : f32
    %7 = vector.broadcast %cst_5 : f32 to vector<2x128xf32>
    %8 = arith.maximumf %6, %7 : vector<2x128xf32>
    %9 = arith.truncf %8 : vector<2x128xf32> to vector<2x128xbf16>
    %c0_6 = arith.constant 0 : index
    %c0_7 = arith.constant 0 : index
    %10 = vector.load %arg4[%c0_6, %c0_7] : memref<128x128xbf16, #tpu.memory_space<vmem>>, vector<128x128xbf16>
    %cst_8 = arith.constant dense<0.000000e+00> : vector<2x128xf32>
    %11 = tpu.matmul %9, %10, %cst_8 {dimension_numbers = #tpu.dot_dimension_numbers<[1], [0], [0], [1], [0, 0, 1, 1], [], []>} : vector<2x128xbf16>, vector<128x128xbf16>, vector<2x128xf32> -> vector<2x128xf32>
    %c0_9 = arith.constant 0 : index
    %c0_10 = arith.constant 0 : index
    %12 = vector.load %arg5[%c0_9, %c0_10] : memref<1x128xf32, #tpu.memory_space<vmem>>, vector<1x128xf32>
    %13 = vector.broadcast %12 : vector<1x128xf32> to vector<2x128xf32>
    %14 = arith.addf %11, %13 : vector<2x128xf32>
    %cst_11 = arith.constant 0.000000e+00 : f32
    %15 = vector.broadcast %cst_11 : f32 to vector<2x128xf32>
    %16 = arith.maximumf %14, %15 : vector<2x128xf32>
    %17 = arith.truncf %16 : vector<2x128xf32> to vector<2x128xbf16>
    %c0_12 = arith.constant 0 : index
    %c0_13 = arith.constant 0 : index
    %18 = vector.load %arg6[%c0_12, %c0_13] : memref<128x128xbf16, #tpu.memory_space<vmem>>, vector<128x128xbf16>
    %cst_14 = arith.constant dense<0.000000e+00> : vector<2x128xf32>
    %19 = tpu.matmul %17, %18, %cst_14 {dimension_numbers = #tpu.dot_dimension_numbers<[1], [0], [0], [1], [0, 0, 1, 1], [], []>} : vector<2x128xbf16>, vector<128x128xbf16>, vector<2x128xf32> -> vector<2x128xf32>
    %c0_15 = arith.constant 0 : index
    %c0_16 = arith.constant 0 : index
    %20 = vector.load %arg7[%c0_15, %c0_16] : memref<1x128xf32, #tpu.memory_space<vmem>>, vector<1x128xf32>
    %21 = vector.broadcast %20 : vector<1x128xf32> to vector<2x128xf32>
    %22 = arith.addf %19, %21 : vector<2x128xf32>
    %c0_17 = arith.constant 0 : index
    %c0_18 = arith.constant 0 : index
    %23 = vector.load %arg8[%c0_17, %c0_18] : memref<2x128xf32, #tpu.memory_space<vmem>>, vector<2x128xf32>
    tpu.vector_store %arg8[%c0_17, %c0_18], %22 {strides = array<i32>} : memref<2x128xf32, #tpu.memory_space<vmem>>, vector<2x128xf32>,
    return
  }
  func.func @transform_0(%arg0: i32) -> (i32, i32) {
    %c0_i32 = arith.constant 0 : i32
    %c0_i32_0 = arith.constant 0 : i32
    return %arg0, %c0_i32 : i32, i32
  }
  func.func @transform_1(%arg0: i32) -> (i32, i32) {
    %c0_i32 = arith.constant 0 : i32
    %c0_i32_0 = arith.constant 0 : i32
    %c0_i32_1 = arith.constant 0 : i32
    return %c0_i32, %c0_i32_0 : i32, i32
  }
  func.func @transform_2(%arg0: i32) -> (i32, i32) {
    %c0_i32 = arith.constant 0 : i32
    %c0_i32_0 = arith.constant 0 : i32
    %c0_i32_1 = arith.constant 0 : i32
    return %c0_i32, %c0_i32_0 : i32, i32
  }
  func.func @transform_3(%arg0: i32) -> (i32, i32) {
    %c0_i32 = arith.constant 0 : i32
    %c0_i32_0 = arith.constant 0 : i32
    %c0_i32_1 = arith.constant 0 : i32
    return %c0_i32, %c0_i32_0 : i32, i32
  }
  func.func @transform_4(%arg0: i32) -> (i32, i32) {
    %c0_i32 = arith.constant 0 : i32
    %c0_i32_0 = arith.constant 0 : i32
    %c0_i32_1 = arith.constant 0 : i32
    return %c0_i32, %c0_i32_0 : i32, i32
  }
  func.func @transform_5(%arg0: i32) -> (i32, i32) {
    %c0_i32 = arith.constant 0 : i32
    %c0_i32_0 = arith.constant 0 : i32
    %c0_i32_1 = arith.constant 0 : i32
    return %c0_i32, %c0_i32_0 : i32, i32
  }
  func.func @transform_6(%arg0: i32) -> (i32, i32) {
    %c0_i32 = arith.constant 0 : i32
    %c0_i32_0 = arith.constant 0 : i32
    %c0_i32_1 = arith.constant 0 : i32
    return %c0_i32, %c0_i32_0 : i32, i32
  }
  func.func @transform_7(%arg0: i32) -> (i32, i32) {
    %c0_i32 = arith.constant 0 : i32
    %c0_i32_0 = arith.constant 0 : i32
    return %arg0, %c0_i32 : i32, i32
  }
}

</mosaic_0001>

<bundles_post_ra>
// kernel: tpu_custom_call.1
= control target key start
LH: loop header
LB: loop body
LE: loop exit
PB: predicated region body
PF: predicated region fallthrough
CT: control target
= control target key end

     0   :  { %12 = vsyncpa [#allocation3], 0  ;;  %s764_s0 = inlined_call_operand.hbm [shape: f32[2,16], index: 0, kind: input, shape index: {}]   ;;  %s765_s1 = inlined_call_operand.hbm [shape: bf16[16,128], index: 1, kind: input, shape index: {}]   ;;  %s766_s2 = inlined_call_operand.vmem [shape: f32[1,128], index: 2, kind: input, shape index: {}]   ;;  %s767_s3 = inlined_call_operand.hbm [shape: bf16[128,128], index: 3, kind: input, shape index: {}]   ;;  %s768_s4 = inlined_call_operand.vmem [shape: f32[1,128], index: 4, kind: input, shape index: {}]   ;;  %s769_s5 = inlined_call_operand.hbm [shape: bf16[128,128], index: 5, kind: input, shape index: {}]   ;;  %s770_s6 = inlined_call_operand.vmem [shape: f32[1,128], index: 6, kind: input, shape index: {}]   ;;  %s771_s7 = inlined_call_operand.hbm [shape: f32[2,128], index: 7, kind: output, shape index: {}]  }
   0x1   :  { %13 = vsyncpa [#allocation6], 0 }
   0x2   :  { %14 = vsyncpa [#allocation9], 0 }
   0x3   :  { %15 = vsyncpa [#allocation4], 0  ;;  %s617_s24 = smov [#allocation5]   ;;  %s499_s28 = scalar_lea.hbm %s765_s1, 128 }
   0x4   :  { %s31_s25 = sshll.u32 %s617_s24, 4  ;;  %p500_p0 = scmp.ne.s32.totalorder %s765_s1, %s499_s28  ;;  %s32_s25 = int_to_ptr.vmem [resolvable:$true] %s31_s25 }
   0x5   :  { %p503_p1 = scmp.lt.u32.totalorder %s499_s28, %s765_s1 }
   0x7   :  { %p505_p2 = pnand %p503_p1, %p500_p0 }
   0x9   :  { %508 = shalt.err (!%p505_p2)
}
   0xa   :  { %s509_s10 = scalar_lea.vmem %s32_s25, 128  ;;  %p514_p4 = scmp.lt.s32.totalorder %s32_s25, %s32_s25 }
   0xb   :  { %p510_p3 = scmp.ne.s32.totalorder %s32_s25, %s509_s10  ;;  %p515_p5 = scmp.lt.s32.totalorder %s509_s10, %s509_s10 }
   0xd   :  { %p516_p6 = por %p515_p5, %p514_p4 }
   0xf   :  { %p517_p7 = pnand %p516_p6, %p510_p3 }
  0x11   :  { %520 = shalt.err (!%p517_p7)
}
  0x12   :  { %s618_s11 = smov 64   ;;  %s619_s12 = smov 4  }
  0x13   :  { %37 = dma.hbm_to_vmem [thread:$0]  %s765_s1, 128, %s32_s25, [#allocation6], %s618_s11, %s618_s11, %s619_s12  }
  0x14   :  { %s620_s15 = smov [#allocation2]   ;;  %s621_s17 = smov [#allocation7]  }
  0x15   :  { %s22_s16 = sshll.u32 %s620_s15, 4  ;;  %s45_s18 = sshll.u32 %s621_s17, 4  ;;  %s23_s16 = int_to_ptr.vmem [resolvable:$true] %s22_s16  ;;  %s46_s18 = int_to_ptr.vmem [resolvable:$true] %s45_s18 }
  0x16   :  { %s521_s21 = scalar_lea.hbm %s764_s0, 32 }
  0x17   :  { %p522_p8 = scmp.ne.s32.totalorder %s764_s0, %s521_s21  ;;  %p525_p9 = scmp.lt.u32.totalorder %s521_s21, %s764_s0 }
  0x19   :  { %p527_p10 = pnand %p525_p9, %p522_p8 }
  0x1b   :  { %530 = shalt.err (!%p527_p10)
}
  0x1c   :  { %s531_s1 = scalar_lea.vmem %s23_s16, 32  ;;  %p536_p12 = scmp.lt.s32.totalorder %s23_s16, %s23_s16 }
  0x1d   :  { %p532_p11 = scmp.ne.s32.totalorder %s23_s16, %s531_s1  ;;  %p537_p13 = scmp.lt.s32.totalorder %s531_s1, %s531_s1 }
  0x1f   :  { %p538_p0 = por %p537_p13, %p536_p12 }
  0x21   :  { %p539_p1 = pnand %p538_p0, %p532_p11 }
  0x23   :  { %542 = shalt.err (!%p539_p1)
}
  0x24   :  { %25 = dma.hbm_to_vmem [thread:$0]  %s764_s0, 32, %s23_s16, [#allocation3]  }
  0x25   :  { %s543_s30 = scalar_lea.hbm %s767_s3, 1024 }
  0x26   :  { %p544_p2 = scmp.ne.s32.totalorder %s767_s3, %s543_s30  ;;  %p547_p3 = scmp.lt.u32.totalorder %s543_s30, %s767_s3 }
  0x28   :  { %p549_p4 = pnand %p547_p3, %p544_p2 }
  0x2a   :  { %552 = shalt.err (!%p549_p4)
}
  0x2b   :  { %s553_s14 = scalar_lea.vmem %s46_s18, 1024  ;;  %p558_p6 = scmp.lt.s32.totalorder %s46_s18, %s46_s18 }
  0x2c   :  { %p554_p5 = scmp.ne.s32.totalorder %s46_s18, %s553_s14  ;;  %p559_p7 = scmp.lt.s32.totalorder %s553_s14, %s553_s14 }
  0x2e   :  { %p560_p8 = por %p559_p7, %p558_p6 }
  0x30   :  { %p561_p9 = pnand %p560_p8, %p554_p5 }
  0x32   :  { %564 = shalt.err (!%p561_p9)
}
  0x33   :  { %51 = dma.hbm_to_vmem [thread:$0]  %s767_s3, 1024, %s46_s18, [#allocation6], %s618_s11, %s618_s11, %s619_s12  }
  0x34   :  { %s622_s16 = smov [#allocation8]   ;;  %s565_s21 = scalar_lea.hbm %s769_s5, 1024 }
  0x35   :  { %s59_s17 = sshll.u32 %s622_s16, 4  ;;  %p566_p10 = scmp.ne.s32.totalorder %s769_s5, %s565_s21  ;;  %s60_s17 = int_to_ptr.vmem [resolvable:$true] %s59_s17 }
  0x36   :  { %p569_p11 = scmp.lt.u32.totalorder %s565_s21, %s769_s5 }
  0x38   :  { %p571_p12 = pnand %p569_p11, %p566_p10 }
  0x3a   :  { %574 = shalt.err (!%p571_p12)
}
  0x3b   :  { %s575_s1 = scalar_lea.vmem %s60_s17, 1024  ;;  %p580_p0 = scmp.lt.s32.totalorder %s60_s17, %s60_s17 }
  0x3c   :  { %p576_p13 = scmp.ne.s32.totalorder %s60_s17, %s575_s1  ;;  %p581_p1 = scmp.lt.s32.totalorder %s575_s1, %s575_s1 }
  0x3e   :  { %p582_p2 = por %p581_p1, %p580_p0 }
  0x40   :  { %p583_p3 = pnand %p582_p2, %p576_p13 }
  0x42   :  { %586 = shalt.err (!%p583_p3)
}
  0x43   :  { %65 = dma.hbm_to_vmem [thread:$0]  %s769_s5, 1024, %s60_s17, [#allocation9], %s618_s11, %s618_s11, %s619_s12  }
  0x44   :  { %609 = dma.done.wait [#allocation3], 32  }
  0x45   :  { %610 = vsyncadd [#allocation3], 4294967264 }
  0x46   :  { %611 = dma.done.wait [#allocation6], 1152  }
  0x47   :  { %612 = vsyncadd [#allocation6], 4294966144 }
  0x48   :  { %613 = dma.done.wait [#allocation9], 1024  }
  0x49   :  { %614 = vsyncadd [#allocation9], 4294966272  ;;  %v623_v0 = vmov 0.0   ;;  %vm624_vm0 = vmmov 0   ;;  %v482_v1 = vld [vmem:[#allocation5] sm:$0xff]   ;;  %vm98_vm1 = vcmask 130048  }
  0x4a   :  { %427 = vmatprep.subr.bf16.mxu0 %v623_v0  ;;  %429 = vmatprep.mubr.msk.bf16.mxu0 %vm624_vm0, %v623_v0  ;;  %v81_v2 = vld [vmem:[#allocation2] sm:$0x3]  ;;  %v483_v4 = vld [vmem:[#allocation7] sm:$0xff]   ;;  %v484_v5 = vld [vmem:[#allocation7 + $0x8] sm:$0xff]   ;;  %s625_s28 = smov [#allocation10]  }
  0x4b   :  { %433 = vmatprep.subr.bf16.mxu1 %v623_v0  ;;  %449 = vmatprep.mubr.msk.bf16.mxu1 %vm624_vm0, %v623_v0  ;;  %v82_v3 = vpack.c.bf16 %v81_v2, %v81_v2  ;;  %v485_v6 = vld [vmem:[#allocation7 + $0x10] sm:$0xff]   ;;  %v486_v7 = vld [vmem:[#allocation7 + $0x18] sm:$0xff]   ;;  %v487_v8 = vld [vmem:[#allocation7 + $0x20] sm:$0xff]   ;;  %s375_s29 = sshll.u32 %s625_s28, 4  ;;  %s376_s29 = int_to_ptr.vmem [resolvable:$true] %s375_s29 }
  0x4c   :  { %428 = vmatpush3.bf16.msra.mxu0 %v482_v1  ;;  %434 = vmatpush3.bf16.msra.mxu1 %v483_v4  ;;  %v488_v9 = vld [vmem:[#allocation7 + $0x28] sm:$0xff]   ;;  %v489_v10 = vld [vmem:[#allocation7 + $0x30] sm:$0xff]   ;;  %v490_v11 = vld [vmem:[#allocation7 + $0x38] sm:$0xff]   ;;  %p592_p5 = scmp.lt.s32.totalorder %s376_s29, %s376_s29 }
  0x4d   :  { %453 = vmatprep.subr.bf16.mxu0 %v623_v0  ;;  %435 = vmatprep.subr.bf16.mxu1 %v623_v0  ;;  %v491_v12 = vld [vmem:[#allocation8] sm:$0xff]   ;;  %v492_v13 = vld [vmem:[#allocation8 + $0x8] sm:$0xff]   ;;  %v493_v14 = vld [vmem:[#allocation8 + $0x10] sm:$0xff]  }
  0x4e   :  { %v494_v15 = vld [vmem:[#allocation8 + $0x18] sm:$0xff]   ;;  %v495_v16 = vld [vmem:[#allocation8 + $0x20] sm:$0xff]   ;;  %v496_v17 = vld [vmem:[#allocation8 + $0x28] sm:$0xff]  }
  0x4f   :  { %430 = vmatmul.mubr.msk.bf16.vlgmr.msra.gmra.mrb[0].mxu0 %vm98_vm1, %v82_v3  ;;  %v386_v18 = vld [vmem:[%s766_s2] ss:$0 sm:$0xff]  ;;  %v498_v27 = vld [vmem:[#allocation8 + $0x38] sm:$0xff]  }
  0x50   :  { %469 = vmatprep.mubr.msk.bf16.mxu0 %vm624_vm0, %v623_v0  ;;  %436 = vmatpush3.bf16.msra.mxu1 %v484_v5  ;;  %v497_v26 = vld [vmem:[#allocation8 + $0x30] sm:$0xff]  }
  0x51   :  { %437 = vmatprep.subr.bf16.mxu1 %v623_v0  ;;  %454 = vmatpush3.bf16.msra.mxu0 %v491_v12  ;;  %v389_v28 = vld [vmem:[%s768_s4] ss:$0 sm:$0xff]  ;;  %s587_s4 = scalar_lea.vmem %s376_s29, 32 }
  0x52   :  { %455 = vmatprep.subr.bf16.mxu0 %v623_v0  ;;  %v398_v36 = vld [vmem:[%s770_s6] ss:$0 sm:$0xff]  ;;  %p588_p4 = scmp.ne.s32.totalorder %s376_s29, %s587_s4  ;;  %p593_p6 = scmp.lt.s32.totalorder %s587_s4, %s587_s4 }
  0x54   :  { %438 = vmatpush3.bf16.msra.mxu1 %v485_v6  ;;  %p594_p7 = por %p593_p6, %p592_p5 }
  0x55   :  { %439 = vmatprep.subr.bf16.mxu1 %v623_v0  ;;  %456 = vmatpush3.bf16.msra.mxu0 %v492_v13 }
  0x56   :  { %457 = vmatprep.subr.bf16.mxu0 %v623_v0  ;;  %p595_p8 = pnand %p594_p7, %p588_p4 }
  0x58   :  { %440 = vmatpush3.bf16.msra.mxu1 %v486_v7 }
  0x59   :  { %441 = vmatprep.subr.bf16.mxu1 %v623_v0  ;;  %458 = vmatpush3.bf16.msra.mxu0 %v493_v14 }
  0x5a   :  { %459 = vmatprep.subr.bf16.mxu0 %v623_v0 }
  0x5c   :  { %442 = vmatpush3.bf16.msra.mxu1 %v487_v8 }
  0x5d   :  { %443 = vmatprep.subr.bf16.mxu1 %v623_v0  ;;  %460 = vmatpush3.bf16.msra.mxu0 %v494_v15 }
  0x5e   :  { %461 = vmatprep.subr.bf16.mxu0 %v623_v0 }
  0x60   :  { %444 = vmatpush3.bf16.msra.mxu1 %v488_v9 }
  0x61   :  { %445 = vmatprep.subr.bf16.mxu1 %v623_v0  ;;  %462 = vmatpush3.bf16.msra.mxu0 %v495_v16 }
  0x62   :  { %463 = vmatprep.subr.bf16.mxu0 %v623_v0 }
  0x64   :  { %446 = vmatpush3.bf16.msra.mxu1 %v489_v10 }
  0x65   :  { %447 = vmatprep.subr.bf16.mxu1 %v623_v0  ;;  %464 = vmatpush3.bf16.msra.mxu0 %v496_v17 }
  0x66   :  { %465 = vmatprep.subr.bf16.mxu0 %v623_v0 }
  0x68   :  { %448 = vmatpush3.bf16.msra.mxu1 %v490_v11 }
  0x69   :  { %466 = vmatpush3.bf16.msra.mxu0 %v497_v26 }
  0x6a   :  { %467 = vmatprep.subr.bf16.mxu0 %v623_v0 }
  0x6d   :  { %468 = vmatpush3.bf16.msra.mxu0 %v498_v27 }
 0x122   :  { %v136_v19 = vpop.f32.mrb[0].mxu0 }
 0x123   :  { %v137_v20 = vadd.f32 %v386_v18, %v136_v19  ;;  %v431_v21 = vpop.f32.mrb[1].mxu0 }
 0x124   :  { %v139_v22 = vpop.f32.mrb[2].mxu0 }
 0x125   :  { %v142_v23 = vmax.f32 %v137_v20, 0.0  ;;  %v432_v24 = vpop.f32.mrb[3].mxu0 }
 0x127   :  { %v143_v25 = vpack.c.bf16 %v142_v23, %v142_v23 }
 0x129   :  { %450 = vmatmul.mubr.bf16.vlgmr.msra.gmra.mrb[0].mxu1 %v143_v25 }
 0x1fc   :  { %v249_v29 = vpop.f32.mrb[0].mxu1 }
 0x1fd   :  { %v250_v30 = vadd.f32 %v389_v28, %v249_v29  ;;  %v451_v31 = vpop.f32.mrb[1].mxu1 }
 0x1fe   :  { %v252_v32 = vpop.f32.mrb[2].mxu1 }
 0x1ff   :  { %v255_v33 = vmax.f32 %v250_v30, 0.0  ;;  %v452_v34 = vpop.f32.mrb[3].mxu1 }
 0x201   :  { %v256_v35 = vpack.c.bf16 %v255_v33, %v255_v33 }
 0x203   :  { %470 = vmatmul.mubr.bf16.vlgmr.msra.gmra.mrb[4].mxu0 %v256_v35 }
 0x2d6   :  { %v362_v37 = vpop.f32.mrb[4].mxu0 }
 0x2d7   :  { %v363_v38 = vadd.f32 %v398_v36, %v362_v37  ;;  %v471_v39 = vpop.f32.mrb[5].mxu0 }
 0x2d8   :  { %v365_v40 = vpop.f32.mrb[6].mxu0 }
 0x2d9   :  { %368 = vst [vmem:[#allocation10] sm:$0x3] %v363_v38  ;;  %v472_v41 = vpop.f32.mrb[7].mxu0 }
 0x2da   :  { %598 = shalt.err (!%p595_p8)
}
 0x2db   :  { %s599_s6 = scalar_lea.hbm %s771_s7, 32 }
 0x2dc   :  { %p600_p9 = scmp.ne.s32.totalorder %s771_s7, %s599_s6  ;;  %p603_p10 = scmp.lt.u32.totalorder %s599_s6, %s771_s7 }
 0x2de   :  { %p605_p11 = pnand %p603_p10, %p600_p9 }
 0x2e0   :  { %608 = shalt.err (!%p605_p11)
}
 0x2e1   :  { %378 = dma.vmem_to_hbm [thread:$0]  %s376_s29, 32, %s771_s7, [#allocation4]  }
 0x2e2   :  { %615 = dma.done.wait [#allocation4], 32  }
 0x2e3   :  { %616 = vsyncadd [#allocation4], 4294967264 }
 0x2e4   :  { %382 = vsyncpa [#allocation3], 1 }
 0x2e5   :  { %383 = vsyncpa [#allocation6], 1 }
 0x2e6   :  { %384 = vsyncpa [#allocation9], 1 }
 0x2e7   :  { %385 = vsyncpa [#allocation4], 1 }

</bundles_post_ra>
